<compile_context>
chip_gen: v7x
topology: tpu7x:2x2x1
jax: 0.10.0
libtpu: 0.0.40
codegen_flags: <defaults>
</compile_context>

<pallas_src>
import jax
import jax.numpy as jnp
from jax import lax
from jax.experimental import pallas as pl
from jax.experimental.pallas import tpu as pltpu

_LANE = 128
# Streamed-block budget: 2 pipeline buffers x (input block + output block).
_BLOCK_BUDGET_BYTES = 24 * 1024 * 1024
# Explicit scoped-VMEM limit, valid on every TPU generation (<= v7x physical).
_VMEM_LIMIT_BYTES = 32 * 1024 * 1024


def _round_up(a: int, b: int) -> int:
    return -(-a // b) * b


def _choose_tiling(n: int, c: int, hw: int, itemsize: int):
    """Pick (batch fold Nb, spatial tile T, padded spatial extent HW_pad)."""
    # Max elements per streamed block: 2 buffers x (in + out) <= budget.
    elem_budget = _BLOCK_BUDGET_BYTES // (4 * itemsize)
    hw_pad = _round_up(hw, _LANE)                      # lane-dense last dim
    t_cap = max(_LANE, (elem_budget // c) // _LANE * _LANE)
    if hw_pad > t_cap:
        t = t_cap                                      # large plane: VMEM-budget cap
    elif n == 1 and hw_pad >= 2 * _LANE:
        t = _round_up(hw_pad // 2, _LANE)              # split space: feed both v7x TCs
    else:
        t = hw_pad                                     # whole (padded) plane per step
    hw_pad = _round_up(hw_pad, t)
    s_steps = hw_pad // t

    # Batch folding: largest divisor of N whose block still fits the budget,
    # while keeping >= 2 total grid steps (megacore) whenever possible.
    nb = 1
    for cand in range(n, 0, -1):
        if n % cand:
            continue
        if cand * c * t > elem_budget:
            continue
        if (n // cand) * s_steps < 2 and n * s_steps >= 2:
            continue
        nb = cand
        break
    return nb, t, hw_pad


# ----------------------------------------------------------------------------
# Pallas kernel: one (Nb batches, full C, T pixels) slab per grid step.
# ----------------------------------------------------------------------------
def attention_kernel(x_ref, w1_ref, b1_ref, w2_ref, b2_ref, o_ref):
    # x_ref:  (Nb, C, T)  input slab (channels on sublanes, pixels on lanes)
    # w1_ref: (C, C) bf16 first 1x1 conv weight, PyTorch (Cout, Cin) layout
    # b1_ref: (C, 1) f32
    # w2_ref: (C, C) bf16 second 1x1 conv weight
    # b2_ref: (C, 1) f32
    # o_ref:  (Nb, C, T)
    w1 = w1_ref[...]
    w2 = w2_ref[...]
    b1 = b1_ref[...]
    b2 = b2_ref[...]
    nb = x_ref.shape[0]
    for b in range(nb):                                # static unroll over folded batches
        x = x_ref[b].astype(jnp.bfloat16)              # (C, T) bf16 MXU operand
        # conv1 (1x1) + bias + ReLU: h[o,p] = sum_c w1[o,c] x[c,p]
        h = jnp.dot(w1, x, preferred_element_type=jnp.float32)
        h = jnp.maximum(h + b1, 0.0)                   # f32 elementwise (VPU)
        # conv2 (1x1) + bias
        x1 = jnp.dot(w2, h.astype(jnp.bfloat16), preferred_element_type=jnp.float32)
        x1 = x1 + b2
        # self-gating: out = x1 * sigmoid(x1)   (sigmoid on the EUP slot)
        o_ref[b] = (x1 * jax.nn.sigmoid(x1)).astype(o_ref.dtype)


# ----------------------------------------------------------------------------
# Wrapper: NCHW in / NCHW out (PyTorch convention).  No dtype conversion
# passes, no transposes — only reshapes and (if HW % 128 != 0) one pad.
# ----------------------------------------------------------------------------
@jax.jit
def attention_pallas(x_nchw, w1, b1, w2, b2):
    N, C, H, W = x_nchw.shape
    HW = H * W
    itemsize = jnp.dtype(x_nchw.dtype).itemsize
    Nb, T, HW_pad = _choose_tiling(N, C, HW, itemsize)

    x = x_nchw.reshape(N, C, HW)
    if HW_pad != HW:
        # Lane-dense padding (pure layout plumbing); padded columns compute
        # finite garbage and are cropped after the call.
        x = jnp.pad(x, ((0, 0), (0, 0), (0, HW_pad - HW)))

    w1m = w1.reshape(C, C).astype(jnp.bfloat16)        # (Cout, Cin), resident
    w2m = w2.reshape(C, C).astype(jnp.bfloat16)
    b1c = b1.reshape(C, 1).astype(jnp.float32)
    b2c = b2.reshape(C, 1).astype(jnp.float32)

    grid = (N // Nb, HW_pad // T)
    flops = 4 * N * HW_pad * C * C                     # two matmuls, 2 FLOPs/MAC
    transcendentals = N * HW_pad * C                   # sigmoid
    bytes_accessed = (2 * N * C * HW_pad * itemsize    # x in + out
                      + 2 * C * C * 2 + 2 * C * 4)     # bf16 weights + f32 biases

    out = pl.pallas_call(
        attention_kernel,
        out_shape=jax.ShapeDtypeStruct((N, C, HW_pad), x.dtype),
        grid=grid,
        in_specs=[
            pl.BlockSpec((Nb, C, T), lambda n, s: (n, 0, s)),
            pl.BlockSpec((C, C), lambda n, s: (0, 0)),
            pl.BlockSpec((C, 1), lambda n, s: (0, 0)),
            pl.BlockSpec((C, C), lambda n, s: (0, 0)),
            pl.BlockSpec((C, 1), lambda n, s: (0, 0)),
        ],
        out_specs=pl.BlockSpec((Nb, C, T), lambda n, s: (n, 0, s)),
        compiler_params=pltpu.CompilerParams(
            dimension_semantics=("parallel", "parallel"),
            vmem_limit_bytes=_VMEM_LIMIT_BYTES),
        cost_estimate=pl.CostEstimate(
            flops=flops, transcendentals=transcendentals,
            bytes_accessed=bytes_accessed),
    )(x, w1m, b1c, w2m, b2c)

    if HW_pad != HW:
        out = out[:, :, :HW]
    return out.reshape(N, C, H, W)


# ----------------------------------------------------------------------------
# Pure-JAX reference (mirrors the PyTorch module) for verification.
# ----------------------------------------------------------------------------
def attention_ref(x_nchw, w1, b1, w2, b2):
    C = w1.shape[0]
    w1m = w1.reshape(C, C)
    w2m = w2.reshape(C, C)
    x1 = jnp.einsum('nchw,oc->nohw', x_nchw, w1m,
                    precision=lax.Precision.HIGHEST) + b1[None, :, None, None]
    x1 = jnp.maximum(x1, 0.0)
    x1 = jnp.einsum('nchw,oc->nohw', x1, w2m,
                    precision=lax.Precision.HIGHEST) + b2[None, :, None, None]
    return x1 * jax.nn.sigmoid(x1)


if __name__ == "__main__":
    # Small shapes consistent with Attention(nf): batch=2, nf=64, spatial=16x16.
    N, C, H, W = 2, 64, 16, 16

    key = jax.random.PRNGKey(0)
    ks = jax.random.split(key, 5)
    x = jax.random.normal(ks[0], (N, C, H, W), jnp.float32)          # NCHW
    # PyTorch Conv2d(nf, nf, 1) weight layout: (Cout, Cin, 1, 1)
    w1 = jax.random.normal(ks[1], (C, C, 1, 1), jnp.float32) * 0.1
    b1 = jax.random.normal(ks[2], (C,), jnp.float32) * 0.1
    w2 = jax.random.normal(ks[3], (C, C, 1, 1), jnp.float32) * 0.1
    b2 = jax.random.normal(ks[4], (C,), jnp.float32) * 0.1

    out = attention_pallas(x, w1, b1, w2, b2)
    out = jax.block_until_ready(out)

    ref = attention_ref(x, w1, b1, w2, b2)
    assert out.shape == (N, C, H, W), out.shape
    # Tolerance sized for bf16 MXU operands with f32 accumulation over K=C=64
    # (observed max |err| is a few 1e-3); elementwise math stays f32.
    assert jnp.allclose(out, ref, atol=1e-2, rtol=1e-2), float(
        jnp.max(jnp.abs(out - ref)))

    print("KERNEL_OK")
</pallas_src>

<mosaic_0001>
module attributes {stable_mosaic.version = 11 : i64} {
  func.func @attention_kernel(%arg0: i32, %arg1: i32, %arg2: memref<1x64x256xf32, #tpu.memory_space<vmem>>, %arg3: memref<64x64xbf16, #tpu.memory_space<vmem>>, %arg4: memref<64x1xf32, #tpu.memory_space<vmem>>, %arg5: memref<64x64xbf16, #tpu.memory_space<vmem>>, %arg6: memref<64x1xf32, #tpu.memory_space<vmem>>, %arg7: memref<1x64x256xf32, #tpu.memory_space<vmem>>) attributes {dimension_semantics = [#tpu.dimension_semantics<parallel>, #tpu.dimension_semantics<parallel>], iteration_bounds = array<i64: 2, 1>, scalar_prefetch = 0 : i64, scratch_operands = 0 : i64, tpu.core_type = #tpu.core_type<tc>, window_params = [{transform_indices = @transform_0, window_bounds = array<i64: 1, 64, 256>}, {pipeline_mode = #tpu.pipeline_mode<synchronous>, transform_indices = @transform_1, window_bounds = array<i64: 64, 64>}, {pipeline_mode = #tpu.pipeline_mode<synchronous>, transform_indices = @transform_2, window_bounds = array<i64: 64, 1>}, {pipeline_mode = #tpu.pipeline_mode<synchronous>, transform_indices = @transform_3, window_bounds = array<i64: 64, 64>}, {pipeline_mode = #tpu.pipeline_mode<synchronous>, transform_indices = @transform_4, window_bounds = array<i64: 64, 1>}, {transform_indices = @transform_5, window_bounds = array<i64: 1, 64, 256>}]} {
    %c0 = arith.constant 0 : index
    %c0_0 = arith.constant 0 : index
    %0 = vector.load %arg3[%c0, %c0_0] : memref<64x64xbf16, #tpu.memory_space<vmem>>, vector<64x64xbf16>
    %c0_1 = arith.constant 0 : index
    %c0_2 = arith.constant 0 : index
    %1 = vector.load %arg5[%c0_1, %c0_2] : memref<64x64xbf16, #tpu.memory_space<vmem>>, vector<64x64xbf16>
    %c0_3 = arith.constant 0 : index
    %c0_4 = arith.constant 0 : index
    %2 = vector.load %arg4[%c0_3, %c0_4] : memref<64x1xf32, #tpu.memory_space<vmem>>, vector<64x1xf32>
    %c0_5 = arith.constant 0 : index
    %c0_6 = arith.constant 0 : index
    %3 = vector.load %arg6[%c0_5, %c0_6] : memref<64x1xf32, #tpu.memory_space<vmem>>, vector<64x1xf32>
    %c0_7 = arith.constant 0 : index
    %c0_8 = arith.constant 0 : index
    %c0_9 = arith.constant 0 : index
    %4 = vector.load %arg2[%c0_7, %c0_8, %c0_9] : memref<1x64x256xf32, #tpu.memory_space<vmem>>, vector<1x64x256xf32>
    %5 = vector.shape_cast %4 : vector<1x64x256xf32> to vector<64x256xf32>
    %6 = arith.truncf %5 : vector<64x256xf32> to vector<64x256xbf16>
    %cst = arith.constant dense<0.000000e+00> : vector<64x256xf32>
    %7 = tpu.matmul %0, %6, %cst {dimension_numbers = #tpu.dot_dimension_numbers<[1], [0], [0], [1], [0, 0, 1, 1], [], []>} : vector<64x64xbf16>, vector<64x256xbf16>, vector<64x256xf32> -> vector<64x256xf32>
    %8 = vector.broadcast %2 : vector<64x1xf32> to vector<64x256xf32>
    %9 = arith.addf %7, %8 : vector<64x256xf32>
    %cst_10 = arith.constant 0.000000e+00 : f32
    %10 = vector.broadcast %cst_10 : f32 to vector<64x256xf32>
    %11 = arith.maximumf %9, %10 : vector<64x256xf32>
    %12 = arith.truncf %11 : vector<64x256xf32> to vector<64x256xbf16>
    %cst_11 = arith.constant dense<0.000000e+00> : vector<64x256xf32>
    %13 = tpu.matmul %1, %12, %cst_11 {dimension_numbers = #tpu.dot_dimension_numbers<[1], [0], [0], [1], [0, 0, 1, 1], [], []>} : vector<64x64xbf16>, vector<64x256xbf16>, vector<64x256xf32> -> vector<64x256xf32>
    %14 = vector.broadcast %3 : vector<64x1xf32> to vector<64x256xf32>
    %15 = arith.addf %13, %14 : vector<64x256xf32>
    %16 = arith.negf %15 : vector<64x256xf32>
    %17 = math.exp %16 : vector<64x256xf32>
    %cst_12 = arith.constant 1.000000e+00 : f32
    %18 = vector.broadcast %cst_12 : f32 to vector<64x256xf32>
    %19 = arith.addf %18, %17 : vector<64x256xf32>
    %20 = arith.divf %18, %19 : vector<64x256xf32>
    %21 = arith.mulf %15, %20 : vector<64x256xf32>
    %c0_13 = arith.constant 0 : index
    %c0_14 = arith.constant 0 : index
    %c0_15 = arith.constant 0 : index
    %22 = vector.load %arg7[%c0_13, %c0_14, %c0_15] : memref<1x64x256xf32, #tpu.memory_space<vmem>>, vector<1x64x256xf32>
    %23 = vector.shape_cast %22 : vector<1x64x256xf32> to vector<64x256xf32>
    %24 = vector.shape_cast %21 : vector<64x256xf32> to vector<1x64x256xf32>
    tpu.vector_store %arg7[%c0_13, %c0_14, %c0_15], %24 {strides = array<i32>} : memref<1x64x256xf32, #tpu.memory_space<vmem>>, vector<1x64x256xf32>,
    return
  }
  func.func @transform_0(%arg0: i32, %arg1: i32) -> (i32, i32, i32) {
    %c0_i32 = arith.constant 0 : i32
    %c0_i32_0 = arith.constant 0 : i32
    return %arg0, %c0_i32, %arg1 : i32, i32, i32
  }
  func.func @transform_1(%arg0: i32, %arg1: i32) -> (i32, i32) {
    %c0_i32 = arith.constant 0 : i32
    %c0_i32_0 = arith.constant 0 : i32
    %c0_i32_1 = arith.constant 0 : i32
    return %c0_i32, %c0_i32_0 : i32, i32
  }
  func.func @transform_2(%arg0: i32, %arg1: i32) -> (i32, i32) {
    %c0_i32 = arith.constant 0 : i32
    %c0_i32_0 = arith.constant 0 : i32
    %c0_i32_1 = arith.constant 0 : i32
    return %c0_i32, %c0_i32_0 : i32, i32
  }
  func.func @transform_3(%arg0: i32, %arg1: i32) -> (i32, i32) {
    %c0_i32 = arith.constant 0 : i32
    %c0_i32_0 = arith.constant 0 : i32
    %c0_i32_1 = arith.constant 0 : i32
    return %c0_i32, %c0_i32_0 : i32, i32
  }
  func.func @transform_4(%arg0: i32, %arg1: i32) -> (i32, i32) {
    %c0_i32 = arith.constant 0 : i32
    %c0_i32_0 = arith.constant 0 : i32
    %c0_i32_1 = arith.constant 0 : i32
    return %c0_i32, %c0_i32_0 : i32, i32
  }
  func.func @transform_5(%arg0: i32, %arg1: i32) -> (i32, i32, i32) {
    %c0_i32 = arith.constant 0 : i32
    %c0_i32_0 = arith.constant 0 : i32
    return %arg0, %c0_i32, %arg1 : i32, i32, i32
  }
}

</mosaic_0001>

<bundles_post_ra>
// kernel: attention_pallas.1
= control target key start
LH: loop header
LB: loop body
LE: loop exit
PB: predicated region body
PF: predicated region fallthrough
CT: control target
= control target key end

     0   :  { %s1050_s18 = smov 0   ;;  %s1052_s19 = smov 0   ;;  %s1280_s0 = inlined_call_operand.vmem [shape: f32[2,64,256], index: 0, kind: input, shape index: {}]   ;;  %s1281_s1 = inlined_call_operand.vmem [shape: bf16[64,64], index: 1, kind: input, shape index: {}]   ;;  %s1282_s2 = inlined_call_operand.vmem [shape: f32[64,1], index: 2, kind: input, shape index: {}]   ;;  %s1283_s3 = inlined_call_operand.vmem [shape: bf16[64,64], index: 3, kind: input, shape index: {}]   ;;  %s1284_s4 = inlined_call_operand.vmem [shape: f32[64,1], index: 4, kind: input, shape index: {}]   ;;  %s1285_s5 = inlined_call_operand.vmem [shape: f32[2,64,256], index: 5, kind: output, shape index: {}]  }
   0x1   :  { %s1054_s20 = smov 0  }
   0x2 LB: > { %s27_s21 = sadd.s32 1, %s1013_s19  ;;  %p855_p0 = scmp.ge.s32.totalorder %s1017_s20, 1  ;;  %s1017_s20 = sphi %s1054_s20, %s15_s20   ;;  %s1013_s19 = sphi %s1052_s19, %s1287_s19   ;;  %s1009_s18 = sphi %s1050_s18, %s1286_s18  }
   0x3   : > { %p29_p1 = scmp.ge.s32.totalorder %s27_s21, 2  ;;  %p208_p2 = scmp.lt.s32.totalorder %s1017_s20, 3 }
   0x5   : > { %s1289_s21 = smov (%p29_p1, %s27_s21), 0  ;;  %p209_p3 = pnand %p855_p0, %p208_p2 }
   0x6   : > { %p245_p4 = scmp.lt.s32.totalorder (!%p209_p3), %s1009_s18, 1  ;;  %v1019_v0 = vmov (!%p209_p3), 0   ;;  %v281_v1 = vld [vmem:[%s1282_s2] sm:$0xff] (!%p209_p3)  ;;  %v283_v2 = vld [vmem:[%s1282_s2 + $0x10] sm:$0xff] (!%p209_p3)  ;;  %v282_v3 = vld [vmem:[%s1282_s2 + $0x8] sm:$0xff] (!%p209_p3)  ;;  %vm381_vm0 = vcmask (!%p209_p3), 523264  }
   0x7   : > { %212 = sbr.rel (%p209_p3) target bundleno = 556 (0x22c), region = 40  ;;  %426 = vmatprep.mubr.bf16.mxu0 (!%p209_p3), %v1019_v0  ;;  %921 = vset.pattern.permute.xlu0 (!%p209_p3), %v1019_v0  ;;  %v284_v4 = vld [vmem:[%s1282_s2 + $0x18] sm:$0xff] (!%p209_p3)  ;;  %v285_v19 = vld [vmem:[%s1282_s2 + $0x20] sm:$0xff] (!%p209_p3)  ;;  %v286_v23 = vld [vmem:[%s1282_s2 + $0x28] sm:$0xff] (!%p209_p3) }
   0x8   : > { %922 = vset.pattern.permute.xlu1 (!%p209_p3), %v1019_v0  ;;  %595 = vmatprep.mubr.bf16.mxu1 (!%p209_p3), %v1019_v0  ;;  %v287_v29 = vld [vmem:[%s1282_s2 + $0x30] sm:$0xff] (!%p209_p3)  ;;  %v288_v30 = vld [vmem:[%s1282_s2 + $0x38] sm:$0xff] (!%p209_p3)  ;;  %v289_v33 = vld [vmem:[%s1284_s4] sm:$0xff] (!%p209_p3) }
   0x9   : > { %323 = vperm.xlu0 (!%p209_p3), %921, %v281_v1   ;;  %333 = vperm.xlu1 (!%p209_p3), %922, %v283_v2   ;;  %v290_v34 = vld [vmem:[%s1284_s4 + $0x8] sm:$0xff] (!%p209_p3)  ;;  %v923_v35 = vld [vmem:[%s1281_s1] sm:$0xff] (!%p209_p3)   ;;  %v291_v36 = vld [vmem:[%s1284_s4 + $0x10] sm:$0xff] (!%p209_p3) }
   0xa   : > { %v292_v37 = vld [vmem:[%s1284_s4 + $0x18] sm:$0xff] (!%p209_p3)  ;;  %v293_v38 = vld [vmem:[%s1284_s4 + $0x20] sm:$0xff] (!%p209_p3)  ;;  %v294_v39 = vld [vmem:[%s1284_s4 + $0x28] sm:$0xff] (!%p209_p3) }
   0xb   : > { %v924_v40 = vld [vmem:[%s1281_s1 + $0x8] sm:$0xff] (!%p209_p3)   ;;  %v295_v41 = vld [vmem:[%s1284_s4 + $0x30] sm:$0xff] (!%p209_p3)  ;;  %v296_v42 = vld [vmem:[%s1284_s4 + $0x38] sm:$0xff] (!%p209_p3) }
   0xc   : > { %v925_v43 = vld [vmem:[%s1281_s1 + $0x10] sm:$0xff] (!%p209_p3)   ;;  %v926_v44 = vld [vmem:[%s1281_s1 + $0x18] sm:$0xff] (!%p209_p3)  }
   0xd   : > { %328 = vperm.xlu0 (!%p209_p3), %921, %v282_v3   ;;  %338 = vperm.xlu1 (!%p209_p3), %922, %v284_v4  }
   0xe   : > { %s1291_s18 = smov (!%p245_p4, %s1009_s18), 1 }
   0xf   : > { %s894_s22 = sshll.u32 %s1291_s18, 7 }
  0x10   : > { %s1086_s29 = scalar_lea.vmem %s1280_s0, %s894_s22  ;;  %s1232_s11 = scalar_lea.vmem %s1285_s5, %s894_s22 }
  0x11   : > { %v298_v5 = vld [vmem:[%s1086_s29 + $0x8] sm:$0xff]  ;;  %v300_v6 = vld [vmem:[%s1086_s29 + $0x18] sm:$0xff]  ;;  %v297_v7 = vld [vmem:[%s1086_s29] sm:$0xff]  ;;  %343 = vperm.xlu0 %921, %v285_v19   ;;  %348 = vperm.xlu1 %922, %v286_v23  }
  0x12   : > { %v314_v8 = vpack.c.bf16 %v300_v6, %v298_v5  ;;  %v299_v9 = vld [vmem:[%s1086_s29 + $0x10] sm:$0xff]  ;;  %v302_v10 = vld [vmem:[%s1086_s29 + $0x28] sm:$0xff]  ;;  %v304_v11 = vld [vmem:[%s1086_s29 + $0x38] sm:$0xff] }
  0x13   : > { %v313_v12 = vpack.c.bf16 %v299_v9, %v297_v7  ;;  %v316_v13 = vpack.c.bf16 %v304_v11, %v302_v10  ;;  %v301_v14 = vld [vmem:[%s1086_s29 + $0x20] sm:$0xff]  ;;  %v303_v15 = vld [vmem:[%s1086_s29 + $0x30] sm:$0xff]  ;;  %v306_v16 = vld [vmem:[%s1086_s29 + $0x48] sm:$0xff] }
  0x14   : > { %394 = vmatprep.subr.bf16.mxu0 %v314_v8  ;;  %v308_v17 = vld [vmem:[%s1086_s29 + $0x58] sm:$0xff]  ;;  %v315_v18 = vpack.c.bf16 %v303_v15, %v301_v14  ;;  %v305_v21 = vld [vmem:[%s1086_s29 + $0x40] sm:$0xff]  ;;  %v307_v22 = vld [vmem:[%s1086_s29 + $0x50] sm:$0xff] }
  0x15   : > { %395 = vmatpush1.bf16.msra.mxu0 %v313_v12  ;;  %v318_v20 = vpack.c.bf16 %v308_v17, %v306_v16  ;;  %v310_v24 = vld [vmem:[%s1086_s29 + $0x68] sm:$0xff]  ;;  %v312_v25 = vld [vmem:[%s1086_s29 + $0x78] sm:$0xff]  ;;  %v309_v26 = vld [vmem:[%s1086_s29 + $0x60] sm:$0xff]  ;;  %v317_v27 = vpack.c.bf16 %v307_v22, %v305_v21  ;;  %353 = vperm.xlu0 %921, %v287_v29  }
  0x16   : > { %396 = vmatprep.subr.bf16.mxu0 %v316_v13  ;;  %v311_v28 = vld [vmem:[%s1086_s29 + $0x70] sm:$0xff]  ;;  %v320_v31 = vpack.c.bf16 %v312_v25, %v310_v24  ;;  %358 = vperm.xlu1 %922, %v288_v30  }
  0x17   : > { %v319_v32 = vpack.c.bf16 %v311_v28, %v309_v26 }
  0x19   : > { %397 = vmatpush1.bf16.msra.mxu0 %v315_v18  ;;  %493 = vperm.xlu0 %921, %v289_v33  }
  0x1a   : > { %398 = vmatprep.subr.bf16.mxu0 %v318_v20  ;;  %498 = vperm.xlu1 %922, %v290_v34  }
  0x1d   : > { %399 = vmatpush1.bf16.msra.mxu0 %v317_v27  ;;  %503 = vperm.xlu0 %921, %v291_v36  }
  0x1e   : > { %400 = vmatprep.subr.bf16.mxu0 %v320_v31  ;;  %508 = vperm.xlu1 %922, %v292_v37  }
  0x21   : > { %401 = vmatpush1.bf16.msra.mxu0 %v319_v32  ;;  %513 = vperm.xlu0 %921, %v293_v38  }
  0x22   : > { %518 = vperm.xlu1 %922, %v294_v39  }
  0x24   : > { %864 = vmatmul.mubr.msk.bf16.vlgmr.msra.gmra.mrb[0].mxu0 %vm381_vm0, %v923_v35 }
  0x25   : > { %436 = vmatprep.mubr.bf16.mxu0 %v1019_v0  ;;  %523 = vperm.xlu0 %921, %v295_v41  }
  0x26   : > { %528 = vperm.xlu1 %922, %v296_v42  }
  0x2c   : > { %865 = vmatmul.mubr.msk.bf16.gmra.mrb[4].mxu0 %vm381_vm0, %v924_v40 }
  0x2d   : > { %446 = vmatprep.mubr.bf16.mxu0 %v1019_v0 }
  0x34   : > { %866 = vmatmul.mubr.msk.bf16.gmra.mrb[8].mxu0 %vm381_vm0, %v925_v43 }
  0x35   : > { %456 = vmatprep.mubr.bf16.mxu0 %v1019_v0 }
  0x3c   : > { %867 = vmatmul.mubr.msk.bf16.gmra.mrb[12].mxu0 %vm381_vm0, %v926_v44 }
  0x88   : > { %v324_v45 = vpop.permute.xlu0 %323  ;;  %v334_v54 = vpop.permute.xlu1 %333 }
  0x8c   : > { %v329_v49 = vpop.permute.xlu0 %328  ;;  %v339_v2 = vpop.permute.xlu1 %338 }
  0x90   : > { %v344_v13 = vpop.permute.xlu0 %343  ;;  %v349_v18 = vpop.permute.xlu1 %348 }
  0x94   : > { %v354_v29 = vpop.permute.xlu0 %353 }
  0x95   : > { %v359_v34 = vpop.permute.xlu1 %358 }
  0xf7   : > { %v428_v46 = vpop.f32.mrb[0].mxu0 }
  0xf8   : > { %v429_v47 = vadd.f32 %v428_v46, %v324_v45  ;;  %v430_v48 = vpop.f32.mrb[1].mxu0  ;;  %v927_v46 = vld [vmem:[%s1283_s3] sm:$0xff]  }
  0xf9   : > { %v431_v50 = vadd.f32 %v430_v48, %v324_v45  ;;  %v432_v51 = vpop.f32.mrb[2].mxu0  ;;  %v929_v48 = vld [vmem:[%s1283_s3 + $0x10] sm:$0xff]  }
  0xfa   : > { %v433_v52 = vadd.f32 %v432_v51, %v329_v49  ;;  %v434_v53 = vpop.f32.mrb[3].mxu0  ;;  %v467_v56 = vmax.f32 %v429_v47, 0.0  ;;  %v928_v47 = vld [vmem:[%s1283_s3 + $0x8] sm:$0xff]  }
  0xfb   : > { %v435_v55 = vadd.f32 %v434_v53, %v329_v49  ;;  %v468_v58 = vmax.f32 %v431_v50, 0.0  ;;  %v930_v49 = vld [vmem:[%s1283_s3 + $0x18] sm:$0xff]   ;;  %v494_v50 = vpop.permute.xlu0 %493 }
  0xfc   : > { %v469_v57 = vmax.f32 %v433_v52, 0.0 }
  0xfd   : > { %v470_v59 = vmax.f32 %v435_v55, 0.0 }
  0xfe   : > { %v483_v60 = vpack.c.bf16 %v469_v57, %v467_v56 }
  0xff   : > { %v438_v61 = vpop.f32.mrb[4].mxu0  ;;  %v484_v62 = vpack.c.bf16 %v470_v59, %v468_v58 }
 0x100   : > { %v439_v63 = vadd.f32 %v438_v61, %v334_v54  ;;  %v440_v1 = vpop.f32.mrb[5].mxu0 }
 0x101   : > { %v441_v3 = vadd.f32 %v440_v1, %v334_v54  ;;  %v442_v4 = vpop.f32.mrb[6].mxu0  ;;  %563 = vmatprep.subr.bf16.mxu1 %v484_v62  ;;  %v499_v54 = vpop.permute.xlu1 %498 }
 0x102   : > { %v443_v5 = vadd.f32 %v442_v4, %v339_v2  ;;  %v444_v6 = vpop.f32.mrb[7].mxu0  ;;  %564 = vmatpush1.bf16.msra.mxu1 %v483_v60  ;;  %v471_v8 = vmax.f32 %v439_v63, 0.0  ;;  %v504_v63 = vpop.permute.xlu0 %503 }
 0x103   : > { %v445_v7 = vadd.f32 %v444_v6, %v339_v2  ;;  %v472_v10 = vmax.f32 %v441_v3, 0.0 }
 0x104   : > { %v473_v9 = vmax.f32 %v443_v5, 0.0 }
 0x105   : > { %v474_v11 = vmax.f32 %v445_v7, 0.0  ;;  %v509_v4 = vpop.permute.xlu1 %508 }
 0x106   : > { %v485_v12 = vpack.c.bf16 %v473_v9, %v471_v8 }
 0x107   : > { %v486_v14 = vpack.c.bf16 %v474_v11, %v472_v10  ;;  %v448_v15 = vpop.f32.mrb[8].mxu0 }
 0x108   : > { %v449_v16 = vadd.f32 %v448_v15, %v344_v13  ;;  %v450_v17 = vpop.f32.mrb[9].mxu0 }
 0x109   : > { %v451_v19 = vadd.f32 %v450_v17, %v344_v13  ;;  %v452_v20 = vpop.f32.mrb[10].mxu0  ;;  %565 = vmatprep.subr.bf16.mxu1 %v486_v14 }
 0x10a   : > { %v453_v21 = vadd.f32 %v452_v20, %v349_v18  ;;  %v454_v22 = vpop.f32.mrb[11].mxu0  ;;  %566 = vmatpush1.bf16.msra.mxu1 %v485_v12  ;;  %v475_v24 = vmax.f32 %v449_v16, 0.0  ;;  %v514_v16 = vpop.permute.xlu0 %513 }
 0x10b   : > { %v455_v23 = vadd.f32 %v454_v22, %v349_v18  ;;  %v476_v26 = vmax.f32 %v451_v19, 0.0 }
 0x10c   : > { %v477_v25 = vmax.f32 %v453_v21, 0.0 }
 0x10d   : > { %v478_v27 = vmax.f32 %v455_v23, 0.0 }
 0x10e   : > { %v487_v28 = vpack.c.bf16 %v477_v25, %v475_v24  ;;  %v519_v24 = vpop.permute.xlu1 %518 }
 0x10f   : > { %v488_v30 = vpack.c.bf16 %v478_v27, %v476_v26  ;;  %v458_v31 = vpop.f32.mrb[12].mxu0 }
 0x110   : > { %v459_v32 = vadd.f32 %v458_v31, %v354_v29  ;;  %v460_v33 = vpop.f32.mrb[13].mxu0 }
 0x111   : > { %v461_v35 = vadd.f32 %v460_v33, %v354_v29  ;;  %v462_v36 = vpop.f32.mrb[14].mxu0  ;;  %567 = vmatprep.subr.bf16.mxu1 %v488_v30 }
 0x112   : > { %v463_v37 = vadd.f32 %v462_v36, %v359_v34  ;;  %v464_v38 = vpop.f32.mrb[15].mxu0  ;;  %568 = vmatpush1.bf16.msra.mxu1 %v487_v28  ;;  %v479_v40 = vmax.f32 %v459_v32, 0.0 }
 0x113   : > { %v465_v39 = vadd.f32 %v464_v38, %v359_v34  ;;  %v480_v42 = vmax.f32 %v461_v35, 0.0  ;;  %v524_v38 = vpop.permute.xlu0 %523 }
 0x114   : > { %v481_v41 = vmax.f32 %v463_v37, 0.0 }
 0x115   : > { %v482_v43 = vmax.f32 %v465_v39, 0.0 }
 0x116   : > { %v489_v44 = vpack.c.bf16 %v481_v41, %v479_v40 }
 0x117   : > { %v490_v45 = vpack.c.bf16 %v482_v43, %v480_v42 }
 0x119   : > { %569 = vmatprep.subr.bf16.mxu1 %v490_v45 }
 0x11a   : > { %570 = vmatpush1.bf16.msra.mxu1 %v489_v44 }
 0x11d   : > { %872 = vmatmul.mubr.msk.bf16.vlgmr.msra.gmra.mrb[0].mxu1 %vm381_vm0, %v927_v46  ;;  %v529_v46 = vpop.permute.xlu1 %528 }
 0x11e   : > { %605 = vmatprep.mubr.bf16.mxu1 %v1019_v0 }
 0x125   : > { %873 = vmatmul.mubr.msk.bf16.gmra.mrb[4].mxu1 %vm381_vm0, %v928_v47 }
 0x126   : > { %615 = vmatprep.mubr.bf16.mxu1 %v1019_v0 }
 0x12d   : > { %874 = vmatmul.mubr.msk.bf16.gmra.mrb[8].mxu1 %vm381_vm0, %v929_v48 }
 0x12e   : > { %625 = vmatprep.mubr.bf16.mxu1 %v1019_v0 }
 0x135   : > { %875 = vmatmul.mubr.msk.bf16.gmra.mrb[12].mxu1 %vm381_vm0, %v930_v49 }
 0x1f0   : > { %v597_v51 = vpop.f32.mrb[0].mxu1 }
 0x1f1   : > { %v1184_v52 = vadd.f32 %v597_v51, %v494_v50  ;;  %v599_v53 = vpop.f32.mrb[1].mxu1 }
 0x1f2   : > { %v1186_v55 = vadd.f32 %v599_v53, %v494_v50  ;;  %v601_v56 = vpop.f32.mrb[2].mxu1 }
 0x1f3   : > { %v876_v57 = vmul.f32 -1.442695, %v1184_v52  ;;  %v1189_v58 = vadd.f32 %v601_v56, %v499_v54  ;;  %v603_v0 = vpop.f32.mrb[3].mxu1 }
 0x1f4   : > { %v877_v59 = vmul.f32 -1.442695, %v1186_v55  ;;  %v1192_v60 = vadd.f32 %v603_v0, %v499_v54 }
 0x1f5   : > { %931 = vpow2.f32 %v876_v57  ;;  %v878_v61 = vmul.f32 -1.442695, %v1189_v58 }
 0x1f6   : > { %933 = vpow2.f32 %v877_v59  ;;  %v879_v62 = vmul.f32 -1.442695, %v1192_v60 }
 0x1f7   : > { %935 = vpow2.f32 %v878_v61 }
 0x1f8   : > { %937 = vpow2.f32 %v879_v62  ;;  %v607_v1 = vpop.f32.mrb[4].mxu1 }
 0x1f9   : > { %v1196_v2 = vadd.f32 %v607_v1, %v504_v63  ;;  %v609_v3 = vpop.f32.mrb[5].mxu1 }
 0x1fa   : > { %v1198_v5 = vadd.f32 %v609_v3, %v504_v63  ;;  %v611_v6 = vpop.f32.mrb[6].mxu1 }
 0x1fb   : > { %v880_v7 = vmul.f32 -1.442695, %v1196_v2  ;;  %v1201_v8 = vadd.f32 %v611_v6, %v509_v4  ;;  %v613_v9 = vpop.f32.mrb[7].mxu1 }
 0x1fc   : > { %v881_v10 = vmul.f32 -1.442695, %v1198_v5  ;;  %v1204_v11 = vadd.f32 %v613_v9, %v509_v4 }
 0x1fd   : > { %939 = vpow2.f32 %v880_v7  ;;  %v882_v12 = vmul.f32 -1.442695, %v1201_v8 }
 0x1fe   : > { %941 = vpow2.f32 %v881_v10  ;;  %v883_v13 = vmul.f32 -1.442695, %v1204_v11 }
 0x1ff   : > { %v932_v14 = vpop.eup %931  ;;  %943 = vpow2.f32 %v882_v12 }
 0x200   : > { %v934_v15 = vpop.eup %933  ;;  %v684_v17 = vadd.f32 1.0, %v932_v14  ;;  %945 = vpow2.f32 %v883_v13  ;;  %v617_v18 = vpop.f32.mrb[8].mxu1 }
 0x201   : > { %v936_v19 = vpop.eup %935  ;;  %v685_v20 = vadd.f32 1.0, %v934_v15  ;;  %v1208_v21 = vadd.f32 %v617_v18, %v514_v16  ;;  %v619_v22 = vpop.f32.mrb[9].mxu1 }
 0x202   : > { %v938_v23 = vpop.eup %937  ;;  %947 = vrcp.f32 %v684_v17  ;;  %v686_v25 = vadd.f32 1.0, %v936_v19  ;;  %v1210_v26 = vadd.f32 %v619_v22, %v514_v16  ;;  %v621_v27 = vpop.f32.mrb[10].mxu1 }
 0x203   : > { %949 = vrcp.f32 %v685_v20  ;;  %v687_v28 = vadd.f32 1.0, %v938_v23  ;;  %v884_v29 = vmul.f32 -1.442695, %v1208_v21  ;;  %v1213_v30 = vadd.f32 %v621_v27, %v519_v24  ;;  %v623_v31 = vpop.f32.mrb[11].mxu1 }
 0x204   : > { %951 = vrcp.f32 %v686_v25  ;;  %v885_v32 = vmul.f32 -1.442695, %v1210_v26  ;;  %v1216_v33 = vadd.f32 %v623_v31, %v519_v24 }
 0x205   : > { %953 = vrcp.f32 %v687_v28  ;;  %v886_v34 = vmul.f32 -1.442695, %v1213_v30 }
 0x206   : > { %955 = vpow2.f32 %v884_v29  ;;  %v887_v35 = vmul.f32 -1.442695, %v1216_v33 }
 0x207   : > { %v940_v36 = vpop.eup %939  ;;  %957 = vpow2.f32 %v885_v32 }
 0x208   : > { %v942_v37 = vpop.eup %941  ;;  %v688_v39 = vadd.f32 1.0, %v940_v36  ;;  %959 = vpow2.f32 %v886_v34  ;;  %v627_v40 = vpop.f32.mrb[12].mxu1 }
 0x209   : > { %v944_v41 = vpop.eup %943  ;;  %v689_v42 = vadd.f32 1.0, %v942_v37  ;;  %961 = vpow2.f32 %v887_v35  ;;  %v1220_v43 = vadd.f32 %v627_v40, %v524_v38  ;;  %v629_v44 = vpop.f32.mrb[13].mxu1 }
 0x20a   : > { %v946_v45 = vpop.eup %945  ;;  %963 = vrcp.f32 %v688_v39  ;;  %v690_v47 = vadd.f32 1.0, %v944_v41  ;;  %v1222_v48 = vadd.f32 %v629_v44, %v524_v38  ;;  %v631_v49 = vpop.f32.mrb[14].mxu1 }
 0x20b   : > { %965 = vrcp.f32 %v689_v42  ;;  %v691_v50 = vadd.f32 1.0, %v946_v45  ;;  %v888_v51 = vmul.f32 -1.442695, %v1220_v43  ;;  %v1225_v53 = vadd.f32 %v631_v49, %v529_v46  ;;  %v633_v54 = vpop.f32.mrb[15].mxu1 }
 0x20c   : > { %v948_v56 = vpop.eup %947  ;;  %967 = vrcp.f32 %v690_v47  ;;  %v889_v57 = vmul.f32 -1.442695, %v1222_v48  ;;  %v1235_v0 = vadd.f32 %v633_v54, %v529_v46 }
 0x20d   : > { %v950_v59 = vpop.eup %949  ;;  %v732_v61 = vmul.f32 %v948_v56, %v1184_v52  ;;  %969 = vrcp.f32 %v691_v50  ;;  %v890_v62 = vmul.f32 -1.442695, %v1225_v53 }
 0x20e   : > { %v952_v63 = vpop.eup %951  ;;  %v733_v1 = vmul.f32 %v950_v59, %v1186_v55  ;;  %971 = vpow2.f32 %v888_v51  ;;  %v891_v3 = vmul.f32 -1.442695, %v1235_v0 }
 0x20f   : > { %v954_v4 = vpop.eup %953  ;;  %748 = vst [vmem:[%s1232_s11] sm:$0xff] %v732_v61  ;;  %v734_v6 = vmul.f32 %v952_v63, %v1189_v58  ;;  %973 = vpow2.f32 %v889_v57 }
 0x210   : > { %v956_v7 = vpop.eup %955  ;;  %749 = vst [vmem:[%s1232_s11 + $0x8] sm:$0xff] %v733_v1  ;;  %v735_v52 = vmul.f32 %v954_v4, %v1192_v60  ;;  %975 = vpow2.f32 %v890_v62 }
 0x211   : > { %v958_v9 = vpop.eup %957  ;;  %750 = vst [vmem:[%s1232_s11 + $0x10] sm:$0xff] %v734_v6  ;;  %v692_v10 = vadd.f32 1.0, %v956_v7  ;;  %977 = vpow2.f32 %v891_v3 }
 0x212   : > { %v960_v12 = vpop.eup %959  ;;  %751 = vst [vmem:[%s1232_s11 + $0x18] sm:$0xff] %v735_v52  ;;  %v693_v55 = vadd.f32 1.0, %v958_v9 }
 0x213   : > { %v962_v13 = vpop.eup %961  ;;  %979 = vrcp.f32 %v692_v10  ;;  %v694_v14 = vadd.f32 1.0, %v960_v12 }
 0x214   : > { %v964_v15 = vpop.eup %963  ;;  %981 = vrcp.f32 %v693_v55  ;;  %v695_v58 = vadd.f32 1.0, %v962_v13 }
 0x215   : > { %v966_v16 = vpop.eup %965  ;;  %v736_v60 = vmul.f32 %v964_v15, %v1196_v2  ;;  %983 = vrcp.f32 %v694_v14 }
 0x216   : > { %v968_v17 = vpop.eup %967  ;;  %v737_v18 = vmul.f32 %v966_v16, %v1198_v5  ;;  %985 = vrcp.f32 %v695_v58 }
 0x217   : > { %v970_v19 = vpop.eup %969  ;;  %752 = vst [vmem:[%s1232_s11 + $0x20] sm:$0xff] %v736_v60  ;;  %v738_v20 = vmul.f32 %v968_v17, %v1201_v8 }
 0x218   : > { %v972_v22 = vpop.eup %971  ;;  %753 = vst [vmem:[%s1232_s11 + $0x28] sm:$0xff] %v737_v18  ;;  %v739_v23 = vmul.f32 %v970_v19, %v1204_v11 }
 0x219   : > { %v974_v24 = vpop.eup %973  ;;  %754 = vst [vmem:[%s1232_s11 + $0x30] sm:$0xff] %v738_v20  ;;  %v696_v25 = vadd.f32 1.0, %v972_v22 }
 0x21a   : > { %v976_v27 = vpop.eup %975  ;;  %755 = vst [vmem:[%s1232_s11 + $0x38] sm:$0xff] %v739_v23  ;;  %v697_v2 = vadd.f32 1.0, %v974_v24 }
 0x21b   : > { %v978_v28 = vpop.eup %977  ;;  %987 = vrcp.f32 %v696_v25  ;;  %v698_v5 = vadd.f32 1.0, %v976_v27 }
 0x21c   : > { %989 = vrcp.f32 %v697_v2  ;;  %v699_v29 = vadd.f32 1.0, %v978_v28 }
 0x21d   : > { %v980_v8 = vpop.eup %979  ;;  %991 = vrcp.f32 %v698_v5 }
 0x21e   : > { %v982_v31 = vpop.eup %981  ;;  %v740_v11 = vmul.f32 %v980_v8, %v1208_v21  ;;  %993 = vrcp.f32 %v699_v29 }
 0x21f   : > { %v984_v32 = vpop.eup %983  ;;  %v741_v34 = vmul.f32 %v982_v31, %v1210_v26 }
 0x220   : > { %v986_v35 = vpop.eup %985  ;;  %756 = vst [vmem:[%s1232_s11 + $0x40] sm:$0xff] %v740_v11  ;;  %v742_v36 = vmul.f32 %v984_v32, %v1213_v30 }
 0x221   : > { %757 = vst [vmem:[%s1232_s11 + $0x48] sm:$0xff] %v741_v34  ;;  %v743_v37 = vmul.f32 %v986_v35, %v1216_v33 }
 0x222   : > { %758 = vst [vmem:[%s1232_s11 + $0x50] sm:$0xff] %v742_v36 }
 0x223   : > { %759 = vst [vmem:[%s1232_s11 + $0x58] sm:$0xff] %v743_v37 }
 0x225   : > { %v988_v38 = vpop.eup %987 }
 0x226   : > { %v990_v39 = vpop.eup %989  ;;  %v744_v21 = vmul.f32 %v988_v38, %v1220_v43 }
 0x227   : > { %v992_v40 = vpop.eup %991  ;;  %v745_v41 = vmul.f32 %v990_v39, %v1222_v48 }
 0x228   : > { %v994_v26 = vpop.eup %993  ;;  %760 = vst [vmem:[%s1232_s11 + $0x60] sm:$0xff] %v744_v21  ;;  %v746_v42 = vmul.f32 %v992_v40, %v1225_v53 }
 0x229   : > { %761 = vst [vmem:[%s1232_s11 + $0x68] sm:$0xff] %v745_v41  ;;  %v747_v30 = vmul.f32 %v994_v26, %v1235_v0 }
 0x22a   : > { %762 = vst [vmem:[%s1232_s11 + $0x70] sm:$0xff] %v746_v42 }
 0x22b   : > { %763 = vst [vmem:[%s1232_s11 + $0x78] sm:$0xff] %v747_v30 }
 0x22c PF: > { %s15_s20 = sadd.s32 1, %s1017_s20   ;;  %s1286_s18 = smov %s1013_s19 }
 0x22d   : > { %p12_p5 = scmp.ge.s32.totalorder %s15_s20, 4   ;;  %s1287_s19 = smov %s1289_s21 }
 0x22f   :  { %14 = sbr.rel (!%p12_p5) target bundleno = 2 (0x2), region = 70 }

</bundles_post_ra>
